<compile_context>
chip_gen: v5e
topology: v5e:2x2
jax: 0.10.0
libtpu: 0.0.40
codegen_flags: <defaults>
</compile_context>

<pallas_src>
import functools

import jax
import jax.numpy as jnp
from jax.experimental import pallas as pl
from jax.experimental.pallas import tpu as pltpu


_SUBLANE = 8
_BLOCK_BUDGET = 4 << 20      # target bytes per x block (HBM-bound => big tiles)


# ---------------------------------------------------------------------------
# Tiling helpers
# ---------------------------------------------------------------------------

def _vmem_limit_bytes(block_bytes, n_pipelined_big):
    """Explicit scoped-VMEM limit: double-buffered big arrays + headroom.

    32 MiB floor (>= v6e/v7x defaults, raises v5e's 16 MiB default) and well
    under v7x's 64 MiB physical VMEM for the block sizes produced below.
    """
    need = 2 * n_pipelined_big * block_bytes + (4 << 20)
    return int(max(32 << 20, need))


def _row_tile(rows, hw, itemsize, budget=_BLOCK_BUDGET):
    """Row tile for the (rows, HW) layout.

    Returns either `rows` (one full block) or a multiple of 8 (sublane packed).
    Grids use pl.cdiv, so the tile does not need to divide `rows`. When the
    whole array would fit in one block, split into two so a v7x chip can use
    both TensorCores.
    """
    row_bytes = max(hw * itemsize, 1)
    t = max(1, budget // row_bytes)
    if t >= rows:
        if rows >= 2 * _SUBLANE:
            half = -(-((rows + 1) // 2) // _SUBLANE) * _SUBLANE
            return min(half, rows)
        return rows
    t = max(_SUBLANE, (t // _SUBLANE) * _SUBLANE)
    return t if t < rows else rows


def _bn_stats_tiles(n, c, hw, itemsize, budget=_BLOCK_BUDGET):
    """(batch_tile, channel_tile) for the (N, C, HW) stats pass."""
    ch_bytes = max(hw * itemsize, 1)
    ct_fit = max(1, budget // ch_bytes)
    if ct_fit >= c:
        ct = c                                         # full-C block is legal
    else:
        ct = min(max(_SUBLANE, (ct_fit // _SUBLANE) * _SUBLANE), c)
    bt = max(1, budget // (ct * ch_bytes))
    bt = min(bt, n)
    return bt, ct


# ---------------------------------------------------------------------------
# Kernels
# ---------------------------------------------------------------------------

def _instance_norm_kernel(x_ref, o_ref, *, eps, inv_hw):
    # x_ref: (RT, HW); each row is one independent (sample, channel) pair.
    # Sum/sumsq form: no full-block `centered` temporary; fused scale+shift out.
    x = x_ref[...].astype(jnp.float32)
    s = jnp.sum(x, axis=-1, keepdims=True)                    # (RT, 1) lane reduce
    sq = jnp.sum(x * x, axis=-1, keepdims=True)
    mean = s * inv_hw
    var = jnp.maximum(sq * inv_hw - mean * mean, 0.0)         # biased variance
    scale = jax.lax.rsqrt(var + eps)                          # EUP slot
    shift = -mean * scale
    o_ref[...] = (x * scale + shift).astype(o_ref.dtype)


def _bn_stats_kernel(x_ref, sum_ref, sumsq_ref, *, bt, n_total, mask_batch):
    # x_ref: (bt, ct, HW).  sum_ref / sumsq_ref: (1, ct, 1), resident across the
    # trailing 'arbitrary' batch axis (C stays on sublanes throughout).
    bi = pl.program_id(1)

    @pl.when(bi == 0)
    def _():
        sum_ref[...] = jnp.zeros_like(sum_ref)
        sumsq_ref[...] = jnp.zeros_like(sumsq_ref)

    x = x_ref[...].astype(jnp.float32)
    if mask_batch:
        # Partial last batch block: zero out padded rows so they do not pollute
        # the per-channel accumulators.
        row = jax.lax.broadcasted_iota(jnp.int32, (bt, 1, 1), 0) + bi * bt
        x = jnp.where(row < n_total, x, 0.0)
    sum_ref[...] += jnp.sum(x, axis=(0, 2), keepdims=True)
    sumsq_ref[...] += jnp.sum(x * x, axis=(0, 2), keepdims=True)


def _scale_shift_kernel(x_ref, scale_ref, shift_ref, o_ref):
    # x: (RT, HW); scale/shift: (RT, 1) -> broadcast along lanes.
    x = x_ref[...].astype(jnp.float32)
    o_ref[...] = (x * scale_ref[...] + shift_ref[...]).astype(o_ref.dtype)


# ---------------------------------------------------------------------------
# Wrappers
# ---------------------------------------------------------------------------

def instance_norm(x, eps=1e-5):
    """nn.InstanceNorm2d(dim) forward (affine=False, batch statistics)."""
    N, C, H, W = x.shape
    HW = H * W
    rows = N * C
    x2 = x.reshape(rows, HW)                     # free view of contiguous NCHW
    rt = _row_tile(rows, HW, x.dtype.itemsize)
    block_bytes = rt * HW * x.dtype.itemsize

    kernel = functools.partial(_instance_norm_kernel,
                               eps=float(eps), inv_hw=1.0 / float(HW))
    out = pl.pallas_call(
        kernel,
        out_shape=jax.ShapeDtypeStruct((rows, HW), x.dtype),
        grid_spec=pltpu.PrefetchScalarGridSpec(
            num_scalar_prefetch=0,
            grid=(pl.cdiv(rows, rt),),
            in_specs=[pl.BlockSpec((rt, HW), lambda i: (i, 0))],
            out_specs=pl.BlockSpec((rt, HW), lambda i: (i, 0)),
        ),
        compiler_params=pltpu.CompilerParams(
            dimension_semantics=("parallel",),
            vmem_limit_bytes=_vmem_limit_bytes(block_bytes, 2)),
    )(x2)
    return out.reshape(N, C, H, W)


def batch_norm(x, gamma=None, beta=None, eps=1e-5):
    """nn.BatchNorm2d(dim) training-mode forward (batch statistics).

    TODO(synk): running_mean / running_var buffer updates (training-mode side
    effect) are not modeled; they do not affect the returned tensor.
    """
    N, C, H, W = x.shape
    HW = H * W
    itemsize = x.dtype.itemsize
    if gamma is None:
        gamma = jnp.ones((C,), jnp.float32)      # BatchNorm2d default weight
    if beta is None:
        beta = jnp.zeros((C,), jnp.float32)      # BatchNorm2d default bias

    # ---- Pass 1: per-channel sum / sum-of-squares (C kept on sublanes) ----
    x3 = x.reshape(N, C, HW)
    bt, ct = _bn_stats_tiles(N, C, HW, itemsize)
    c_tiles = pl.cdiv(C, ct)
    b_tiles = pl.cdiv(N, bt)
    mask_batch = (N % bt) != 0
    stats_block_bytes = bt * ct * HW * itemsize

    stats_kernel = functools.partial(
        _bn_stats_kernel, bt=bt, n_total=N, mask_batch=mask_batch)
    s, sq = pl.pallas_call(
        stats_kernel,
        out_shape=(jax.ShapeDtypeStruct((1, C, 1), jnp.float32),
                   jax.ShapeDtypeStruct((1, C, 1), jnp.float32)),
        grid_spec=pltpu.PrefetchScalarGridSpec(
            num_scalar_prefetch=0,
            grid=(c_tiles, b_tiles),
            in_specs=[pl.BlockSpec((bt, ct, HW), lambda ci, bi: (bi, ci, 0))],
            out_specs=(pl.BlockSpec((1, ct, 1), lambda ci, bi: (0, ci, 0)),
                       pl.BlockSpec((1, ct, 1), lambda ci, bi: (0, ci, 0))),
        ),
        compiler_params=pltpu.CompilerParams(
            dimension_semantics=("parallel", "arbitrary"),
            vmem_limit_bytes=_vmem_limit_bytes(stats_block_bytes, 1)),
    )(x3)

    # Tiny per-channel math in plain JAX (f32, biased variance, folded affine).
    # Note: E[x^2]-E[x]^2 can lose precision for huge N*HW / large means.
    count = float(N * HW)
    mean = s.reshape(C) / count
    var = jnp.maximum(sq.reshape(C) / count - mean * mean, 0.0)
    scale = gamma.astype(jnp.float32) * jax.lax.rsqrt(var + eps)
    shift = beta.astype(jnp.float32) - mean * scale

    # ---- Pass 2: fused normalize+affine on the lane-dense (N*C, HW) view ----
    rows = N * C
    x2 = x.reshape(rows, HW)
    scale_rows = jnp.tile(scale, N).reshape(rows, 1)   # row r -> channel r % C
    shift_rows = jnp.tile(shift, N).reshape(rows, 1)
    rt = _row_tile(rows, HW, itemsize)
    block_bytes = rt * HW * itemsize

    out = pl.pallas_call(
        _scale_shift_kernel,
        out_shape=jax.ShapeDtypeStruct((rows, HW), x.dtype),
        grid_spec=pltpu.PrefetchScalarGridSpec(
            num_scalar_prefetch=0,
            grid=(pl.cdiv(rows, rt),),
            in_specs=[pl.BlockSpec((rt, HW), lambda i: (i, 0)),
                      pl.BlockSpec((rt, 1), lambda i: (i, 0)),
                      pl.BlockSpec((rt, 1), lambda i: (i, 0))],
            out_specs=pl.BlockSpec((rt, HW), lambda i: (i, 0)),
        ),
        compiler_params=pltpu.CompilerParams(
            dimension_semantics=("parallel",),
            vmem_limit_bytes=_vmem_limit_bytes(block_bytes, 2)),
    )(x2, scale_rows, shift_rows)
    return out.reshape(N, C, H, W)


def custom_norm(x, norm_type, gamma=None, beta=None, eps=1e-5):
    """Forward of CustomNorm(norm_type, dim) on x: (N, C, H, W)."""
    if norm_type == "in":
        return instance_norm(x, eps=eps)
    elif norm_type == "bn":
        return batch_norm(x, gamma=gamma, beta=beta, eps=eps)
    raise ValueError(f"unsupported norm_type: {norm_type!r}")


# ---------------------------------------------------------------------------
# Pure-JAX references (PyTorch semantics)
# ---------------------------------------------------------------------------

def instance_norm_ref(x, eps=1e-5):
    mean = x.mean(axis=(2, 3), keepdims=True)
    var = x.var(axis=(2, 3), keepdims=True)            # biased
    return (x - mean) / jnp.sqrt(var + eps)


def batch_norm_ref(x, gamma, beta, eps=1e-5):
    mean = x.mean(axis=(0, 2, 3), keepdims=True)
    var = x.var(axis=(0, 2, 3), keepdims=True)          # biased
    y = (x - mean) / jnp.sqrt(var + eps)
    return y * gamma.reshape(1, -1, 1, 1) + beta.reshape(1, -1, 1, 1)


if __name__ == "__main__":
    key = jax.random.PRNGKey(0)
    N, C, H, W = 2, 4, 16, 16
    x = jax.random.normal(key, (N, C, H, W), dtype=jnp.float32)

    # norm_type == 'in'  (InstanceNorm2d)
    out_in = jax.block_until_ready(custom_norm(x, "in"))
    ref_in = instance_norm_ref(x)
    assert out_in.shape == (N, C, H, W)
    assert jnp.allclose(out_in, ref_in, atol=1e-5, rtol=1e-5), "IN mismatch"

    # norm_type == 'bn'  (BatchNorm2d, training-mode forward; default init)
    gamma = jnp.ones((C,), jnp.float32)
    beta = jnp.zeros((C,), jnp.float32)
    out_bn = jax.block_until_ready(custom_norm(x, "bn", gamma=gamma, beta=beta))
    ref_bn = batch_norm_ref(x, gamma, beta)
    assert out_bn.shape == (N, C, H, W)
    assert jnp.allclose(out_bn, ref_bn, atol=1e-5, rtol=1e-5), "BN mismatch"

    print("KERNEL_OK")
</pallas_src>

<mosaic_0001>
module attributes {stable_mosaic.version = 11 : i64} {
  func.func @_instance_norm_kernel(%arg0: i32, %arg1: memref<8x256xf32, #tpu.memory_space<vmem>>, %arg2: memref<8x256xf32, #tpu.memory_space<vmem>>) attributes {dimension_semantics = [#tpu.dimension_semantics<parallel>], iteration_bounds = array<i64: 1>, scalar_prefetch = 0 : i64, scratch_operands = 0 : i64, tpu.core_type = #tpu.core_type<tc>, window_params = [{transform_indices = @transform_0, window_bounds = array<i64: 8, 256>}, {transform_indices = @transform_1, window_bounds = array<i64: 8, 256>}]} {
    %c0 = arith.constant 0 : index
    %c0_0 = arith.constant 0 : index
    %0 = vector.load %arg1[%c0, %c0_0] : memref<8x256xf32, #tpu.memory_space<vmem>>, vector<8x256xf32>
    %cst = arith.constant dense<0.000000e+00> : vector<8xf32>
    %1 = vector.multi_reduction <add>, %0, %cst [1] : vector<8x256xf32> to vector<8xf32>
    %2 = vector.shape_cast %1 : vector<8xf32> to vector<8x1xf32>
    %3 = arith.mulf %0, %0 : vector<8x256xf32>
    %cst_1 = arith.constant dense<0.000000e+00> : vector<8xf32>
    %4 = vector.multi_reduction <add>, %3, %cst_1 [1] : vector<8x256xf32> to vector<8xf32>
    %5 = vector.shape_cast %4 : vector<8xf32> to vector<8x1xf32>
    %cst_2 = arith.constant 3.906250e-03 : f32
    %6 = vector.broadcast %cst_2 : f32 to vector<8x1xf32>
    %7 = arith.mulf %2, %6 : vector<8x1xf32>
    %cst_3 = arith.constant 3.906250e-03 : f32
    %8 = vector.broadcast %cst_3 : f32 to vector<8x1xf32>
    %9 = arith.mulf %5, %8 : vector<8x1xf32>
    %10 = arith.mulf %7, %7 : vector<8x1xf32>
    %11 = arith.subf %9, %10 : vector<8x1xf32>
    %cst_4 = arith.constant 0.000000e+00 : f32
    %12 = vector.broadcast %cst_4 : f32 to vector<8x1xf32>
    %13 = arith.maximumf %11, %12 : vector<8x1xf32>
    %cst_5 = arith.constant 9.99999974E-6 : f32
    %14 = vector.broadcast %cst_5 : f32 to vector<8x1xf32>
    %15 = arith.addf %13, %14 : vector<8x1xf32>
    %16 = math.rsqrt %15 : vector<8x1xf32>
    %cst_6 = arith.constant 0.000000e+00 : f32
    %17 = vector.broadcast %cst_6 : f32 to vector<8x1xf32>
    %18 = arith.subf %17, %7 : vector<8x1xf32>
    %19 = arith.mulf %18, %16 : vector<8x1xf32>
    %20 = vector.broadcast %16 : vector<8x1xf32> to vector<8x256xf32>
    %21 = arith.mulf %0, %20 : vector<8x256xf32>
    %22 = vector.broadcast %19 : vector<8x1xf32> to vector<8x256xf32>
    %23 = arith.addf %21, %22 : vector<8x256xf32>
    %c0_7 = arith.constant 0 : index
    %c0_8 = arith.constant 0 : index
    %24 = vector.load %arg2[%c0_7, %c0_8] : memref<8x256xf32, #tpu.memory_space<vmem>>, vector<8x256xf32>
    tpu.vector_store %arg2[%c0_7, %c0_8], %23 {strides = array<i32>} : memref<8x256xf32, #tpu.memory_space<vmem>>, vector<8x256xf32>,
    return
  }
  func.func @transform_0(%arg0: i32) -> (i32, i32) {
    %c0_i32 = arith.constant 0 : i32
    %c0_i32_0 = arith.constant 0 : i32
    return %arg0, %c0_i32 : i32, i32
  }
  func.func @transform_1(%arg0: i32) -> (i32, i32) {
    %c0_i32 = arith.constant 0 : i32
    %c0_i32_0 = arith.constant 0 : i32
    return %arg0, %c0_i32 : i32, i32
  }
}

</mosaic_0001>

<bundles_post_ra>
// kernel: tpu_custom_call.1
= control target key start
LH: loop header
LB: loop body
LE: loop exit
PB: predicated region body
PF: predicated region fallthrough
CT: control target
= control target key end

     0   :  { %6 = vsyncpa [#allocation3], 0  ;;  %s148_s0 = inlined_call_operand.hbm [shape: f32[8,256], index: 0, kind: input, shape index: {}]   ;;  %s149_s1 = inlined_call_operand.hbm [shape: f32[8,256], index: 1, kind: output, shape index: {}]  }
   0x1   :  { %7 = vsyncpa [#allocation4], 0  ;;  %s13_s8 = sshll.u32 %s148_s0, 4  ;;  %s130_s9 = smov [#allocation2]   ;;  %s14_s8 = int_to_ptr.hbm [resolvable:$true] %s13_s8 }
   0x2   :  { %s15_s10 = sshll.u32 %s130_s9, 4  ;;  %s16_s10 = int_to_ptr.vmem [resolvable:$true] %s15_s10 }
   0x3   :  { %18 = dma.hbm_to_vmem [thread:$0]  %s14_s8, 256, %s16_s10, [#allocation3]  }
   0x4   :  { %126 = dma.done.wait [#allocation3], 256  }
   0x5   :  { %127 = vsyncadd [#allocation3], 4294967040  ;;  %v23_v0 = vld [vmem:[#allocation2] sm:$0xff]  ;;  %v24_v1 = vld [vmem:[#allocation2 + $0x8] sm:$0xff]  ;;  %s131_s0 = smov [#allocation5]   ;;  %s64_s14 = sshll.u32 %s149_s1, 4  ;;  %s65_s14 = int_to_ptr.hbm [resolvable:$true] %s64_s14 }
   0x6   :  { %v25_v2 = vadd.f32 %v24_v1, %v23_v0  ;;  %v28_v3 = vmul.f32 %v23_v0, %v23_v0  ;;  %v29_v4 = vmul.f32 %v24_v1, %v24_v1  ;;  %s62_s11 = sshll.u32 %s131_s0, 4  ;;  %s63_s11 = int_to_ptr.vmem [resolvable:$true] %s62_s11 }
   0x8   :  { %26 = vadd.xlane.f32.xlu0 %v25_v2  ;;  %v30_v5 = vadd.f32 %v29_v4, %v28_v3 }
  0x10   :  { %31 = vadd.xlane.f32.xlu0 %v30_v5 }
  0x7b   :  { %v27_v6 = vpop.xlane.xlu0 %26 }
  0x7c   :  { %v33_v7 = vmul.f32 0.00390625, %v27_v6 }
  0x7e   :  { %v35_v9 = vmul.f32 %v33_v7, %v33_v7  ;;  %v49_v20 = vsub.f32 0.0, %v33_v7 }
  0x83   :  { %v32_v8 = vpop.xlane.xlu0 %31 }
  0x84   :  { %v34_v10 = vmul.f32 0.00390625, %v32_v8 }
  0x86   :  { %v36_v11 = vsub.f32 %v34_v10, %v35_v9 }
  0x88   :  { %v37_v12 = vmax.f32 %v36_v11, 0.0 }
  0x8a   :  { %v38_v13 = vadd.f32 1e-05, %v37_v12 }
  0x8c   :  { %76 = vrsqrt.f32 %v38_v13  ;;  %vm45_vm1 = vweird.f32 %v38_v13 }
  0x92   :  { %v77_v14 = vpop.eup %76 }
  0x93   :  { %v40_v15 = vmul.f32 %v77_v14, %v38_v13  ;;  %vm46_vm0 = vweird.f32 %v77_v14 }
  0x94   :  { %vm47_vm2 = vmor %vm45_vm1, %vm46_vm0 }
  0x95   :  { %v41_v16 = vmul.f32 %v77_v14, %v40_v15 }
  0x97   :  { %v42_v17 = vmul.f32 0.5, %v41_v16 }
  0x99   :  { %v43_v18 = vsub.f32 1.5, %v42_v17 }
  0x9b   :  { %v44_v19 = vmul.f32 %v77_v14, %v43_v18 }
  0x9d   :  { %v48_v21 = vsel %vm47_vm2, %v77_v14, %v44_v19 }
  0x9e   :  { %v50_v22 = vmul.f32 %v49_v20, %v48_v21  ;;  %v51_v23 = vmul.f32 %v48_v21, %v23_v0  ;;  %v52_v24 = vmul.f32 %v48_v21, %v24_v1 }
  0xa0   :  { %v53_v25 = vadd.f32 %v51_v23, %v50_v22  ;;  %v54_v26 = vadd.f32 %v52_v24, %v50_v22 }
  0xa2   :  { %55 = vst [vmem:[#allocation5] sm:$0xff] %v53_v25 }
  0xa3   :  { %56 = vst [vmem:[#allocation5 + $0x8] sm:$0xff] %v54_v26 }
  0xa4   :  { %67 = dma.vmem_to_hbm [thread:$0]  %s63_s11, 256, %s65_s14, [#allocation4]  }
  0xa5   :  { %128 = dma.done.wait [#allocation4], 256  }
  0xa6   :  { %129 = vsyncadd [#allocation4], 4294967040 }
  0xa7   :  { %72 = vsyncpa [#allocation3], 1 }
  0xa8   :  { %73 = vsyncpa [#allocation4], 1 }

</bundles_post_ra>
